<compile_context>
chip_gen: v6e
topology: v6e:2x2x1
jax: 0.10.0
libtpu: 0.0.40
codegen_flags: <defaults>
</compile_context>

<pallas_src>
import functools

import jax
import jax.numpy as jnp
from jax.experimental import pallas as pl
from jax.experimental.pallas import tpu as pltpu


def _round_up(x, m):
    return ((x + m - 1) // m) * m


def _deformer_kernel(x_ref, w1_ref, b1_ref, w2_ref, b2_ref, w3_ref, b3_ref,
                     o_ref, *, residual: bool):
    # Lane-dense layout (rows on lanes):
    #   x_ref : (C_in, TM)     w1: (H, C_in)   b1: (H, 1)
    #   w2    : (H, H)         b2: (H, 1)
    #   w3    : (C_out, H)     b3: (C_out, 1)
    #   o_ref : (C_out, TM)
    x = x_ref[...].astype(jnp.float32)                 # (C_in, TM)
    w1 = w1_ref[...]
    c_in = w1.shape[1]

    # Layer 1: Linear(C_in -> H).  K = C_in is tiny (3): unrolled VPU
    # broadcast MACs -- no padded MXU push, no relayout of a skinny operand.
    h1 = w1[:, 0:1] * x[0:1, :]                        # (H, TM)
    for c in range(1, c_in):
        h1 = h1 + w1[:, c:c + 1] * x[c:c + 1, :]
    h1 = jnp.maximum(h1 + b1_ref[...], 0.0)

    # Layer 2: Linear(H -> H) on the MXU.  TM stays on lanes -> (H, TM).
    h2 = jnp.dot(w2_ref[...], h1, preferred_element_type=jnp.float32)
    h2 = jnp.maximum(h2 + b2_ref[...], 0.0)

    # Layer 3: Linear(H -> C_out).  Operands already MXU-oriented; output
    # (C_out, TM) is lane-dense so the final store is unmasked.
    y = jnp.dot(w3_ref[...], h2, preferred_element_type=jnp.float32)
    y = y + b3_ref[...]

    if residual:           # mode == 'batch'
        y = x + y
    else:                  # other modes: fc(x) * 0.1
        y = y * 0.1
    o_ref[...] = y.astype(o_ref.dtype)


def vertex_deformer(vertices, params, *, tile_m=8192, mode='batch',
                    vmem_limit_bytes=None):
    """vertices: [B, N, C_in] float32.
    params: PyTorch-layout weights (w: [fan_out, fan_in], b: [fan_out, 1]).
    Returns [B, N, C_out]."""
    w1, b1, w2, b2, w3, b3 = params
    B, N, C_in = vertices.shape
    H = w1.shape[0]
    C_out = w3.shape[0]
    if mode == 'batch':
        assert C_in == C_out, "residual mode requires in_features == out_features"

    M = B * N

    # --- Tile sizing --------------------------------------------------------
    # Keep the two (H, tile_m) f32 intermediates + double-buffered I/O well
    # under the v7x scoped-VMEM default (~32 MiB of a 64 MiB VMEM).
    vmem_budget = 24 * 1024 * 1024
    bytes_per_row = 4 * (2 * H + 2 * (C_in + C_out))
    tile_cap = max(512, (vmem_budget // bytes_per_row) // 128 * 128)
    tile_m = min(tile_m, tile_cap)
    # Don't pad a tiny mesh up to a huge tile.
    tile_m = min(tile_m, _round_up(M, 512))
    tile_m = _round_up(tile_m, 128)          # lane-dense tiles
    M_pad = _round_up(M, tile_m)

    # --- Layout plumbing (pure XLA): rows -> lanes, zero-pad the tail -------
    x_t = vertices.reshape(M, C_in).T        # (C_in, M)
    if M_pad != M:
        x_t = jnp.pad(x_t, ((0, 0), (0, M_pad - M)))

    grid = (M_pad // tile_m,)                # 'parallel' -> split across TCs

    flops = 2 * M_pad * (C_in * H + H * H + H * C_out) + 4 * M_pad * H
    bytes_accessed = 4 * (M_pad * (C_in + C_out)
                          + C_in * H + H * H + H * C_out + 2 * H + C_out)
    cost = pl.CostEstimate(flops=flops, transcendentals=0,
                           bytes_accessed=bytes_accessed)

    out_t = pl.pallas_call(
        functools.partial(_deformer_kernel, residual=(mode == 'batch')),
        out_shape=jax.ShapeDtypeStruct((C_out, M_pad), vertices.dtype),
        grid_spec=pltpu.PrefetchScalarGridSpec(
            num_scalar_prefetch=0,
            grid=grid,
            in_specs=[
                pl.BlockSpec((C_in, tile_m), lambda i: (0, i)),   # x (rows on lanes)
                pl.BlockSpec((H, C_in), lambda i: (0, 0)),        # W1
                pl.BlockSpec((H, 1), lambda i: (0, 0)),           # b1
                pl.BlockSpec((H, H), lambda i: (0, 0)),           # W2
                pl.BlockSpec((H, 1), lambda i: (0, 0)),           # b2
                pl.BlockSpec((C_out, H), lambda i: (0, 0)),       # W3
                pl.BlockSpec((C_out, 1), lambda i: (0, 0)),       # b3
            ],
            out_specs=pl.BlockSpec((C_out, tile_m), lambda i: (0, i)),
        ),
        compiler_params=pltpu.CompilerParams(
            dimension_semantics=("parallel",),
            vmem_limit_bytes=vmem_limit_bytes),
        cost_estimate=cost,
    )(x_t, w1, b1, w2, b2, w3, b3)

    return out_t[:, :M].T.reshape(B, N, C_out)


def init_params(key, in_features=3, out_features=3, hidden_dim=256):
    """Deterministic init mimicking nn.Linear (uniform +/- 1/sqrt(fan_in)).
    Weights kept in PyTorch storage layout [fan_out, fan_in]; biases [fan_out, 1]."""
    ks = jax.random.split(key, 6)

    def lin(kw, kb, fan_in, fan_out):
        bound = float(1.0 / (fan_in ** 0.5))
        w = jax.random.uniform(kw, (fan_out, fan_in), jnp.float32, -bound, bound)
        b = jax.random.uniform(kb, (fan_out, 1), jnp.float32, -bound, bound)
        return w, b

    w1, b1 = lin(ks[0], ks[1], in_features, hidden_dim)
    w2, b2 = lin(ks[2], ks[3], hidden_dim, hidden_dim)
    w3, b3 = lin(ks[4], ks[5], hidden_dim, out_features)
    return (w1, b1, w2, b2, w3, b3)


def _reference(vertices, params, mode='batch'):
    w1, b1, w2, b2, w3, b3 = params
    x = vertices
    h1 = jnp.maximum(x @ w1.T + b1[:, 0], 0.0)
    h2 = jnp.maximum(h1 @ w2.T + b2[:, 0], 0.0)
    y = h2 @ w3.T + b3[:, 0]
    return x + y if mode == 'batch' else y * 0.1


if __name__ == "__main__":
    key = jax.random.PRNGKey(0)
    k_x, k_p = jax.random.split(key)

    # Small shapes; N chosen so B*N is NOT a multiple of 128 to exercise the
    # padded-tail path.
    B, N, C_IN, C_OUT, HIDDEN = 2, 300, 3, 3, 32
    vertices = jax.random.normal(k_x, (B, N, C_IN), jnp.float32)
    params = init_params(k_p, C_IN, C_OUT, HIDDEN)

    out = vertex_deformer(vertices, params, mode='batch')
    out = jax.block_until_ready(out)

    ref = _reference(vertices, params, mode='batch')
    assert out.shape == (B, N, C_OUT)
    assert jnp.allclose(out, ref, atol=2e-5, rtol=2e-5), \
        float(jnp.max(jnp.abs(out - ref)))

    print("KERNEL_OK")
</pallas_src>

<mosaic_0001>
module attributes {stable_mosaic.version = 11 : i64} {
  func.func @_deformer_kernel(%arg0: i32, %arg1: memref<3x1024xf32, #tpu.memory_space<vmem>>, %arg2: memref<32x3xf32, #tpu.memory_space<vmem>>, %arg3: memref<32x1xf32, #tpu.memory_space<vmem>>, %arg4: memref<32x32xf32, #tpu.memory_space<vmem>>, %arg5: memref<32x1xf32, #tpu.memory_space<vmem>>, %arg6: memref<3x32xf32, #tpu.memory_space<vmem>>, %arg7: memref<3x1xf32, #tpu.memory_space<vmem>>, %arg8: memref<3x1024xf32, #tpu.memory_space<vmem>>) attributes {dimension_semantics = [#tpu.dimension_semantics<parallel>], iteration_bounds = array<i64: 1>, scalar_prefetch = 0 : i64, scratch_operands = 0 : i64, tpu.core_type = #tpu.core_type<tc>, window_params = [{transform_indices = @transform_0, window_bounds = array<i64: 3, 1024>}, {pipeline_mode = #tpu.pipeline_mode<synchronous>, transform_indices = @transform_1, window_bounds = array<i64: 32, 3>}, {pipeline_mode = #tpu.pipeline_mode<synchronous>, transform_indices = @transform_2, window_bounds = array<i64: 32, 1>}, {pipeline_mode = #tpu.pipeline_mode<synchronous>, transform_indices = @transform_3, window_bounds = array<i64: 32, 32>}, {pipeline_mode = #tpu.pipeline_mode<synchronous>, transform_indices = @transform_4, window_bounds = array<i64: 32, 1>}, {pipeline_mode = #tpu.pipeline_mode<synchronous>, transform_indices = @transform_5, window_bounds = array<i64: 3, 32>}, {pipeline_mode = #tpu.pipeline_mode<synchronous>, transform_indices = @transform_6, window_bounds = array<i64: 3, 1>}, {transform_indices = @transform_7, window_bounds = array<i64: 3, 1024>}]} {
    %c0 = arith.constant 0 : index
    %c0_0 = arith.constant 0 : index
    %0 = vector.load %arg1[%c0, %c0_0] : memref<3x1024xf32, #tpu.memory_space<vmem>>, vector<3x1024xf32>
    %c0_1 = arith.constant 0 : index
    %c0_2 = arith.constant 0 : index
    %1 = vector.load %arg2[%c0_1, %c0_2] : memref<32x3xf32, #tpu.memory_space<vmem>>, vector<32x3xf32>
    %2 = vector.extract_strided_slice %1 {offsets = [0, 0], sizes = [32, 1], strides = [1, 1]} : vector<32x3xf32> to vector<32x1xf32>
    %3 = vector.extract_strided_slice %0 {offsets = [0, 0], sizes = [1, 1024], strides = [1, 1]} : vector<3x1024xf32> to vector<1x1024xf32>
    %4 = vector.broadcast %2 : vector<32x1xf32> to vector<32x1024xf32>
    %5 = vector.broadcast %3 : vector<1x1024xf32> to vector<32x1024xf32>
    %6 = arith.mulf %4, %5 : vector<32x1024xf32>
    %7 = vector.extract_strided_slice %1 {offsets = [0, 1], sizes = [32, 1], strides = [1, 1]} : vector<32x3xf32> to vector<32x1xf32>
    %8 = vector.extract_strided_slice %0 {offsets = [1, 0], sizes = [1, 1024], strides = [1, 1]} : vector<3x1024xf32> to vector<1x1024xf32>
    %9 = vector.broadcast %7 : vector<32x1xf32> to vector<32x1024xf32>
    %10 = vector.broadcast %8 : vector<1x1024xf32> to vector<32x1024xf32>
    %11 = arith.mulf %9, %10 : vector<32x1024xf32>
    %12 = arith.addf %6, %11 : vector<32x1024xf32>
    %13 = vector.extract_strided_slice %1 {offsets = [0, 2], sizes = [32, 1], strides = [1, 1]} : vector<32x3xf32> to vector<32x1xf32>
    %14 = vector.extract_strided_slice %0 {offsets = [2, 0], sizes = [1, 1024], strides = [1, 1]} : vector<3x1024xf32> to vector<1x1024xf32>
    %15 = vector.broadcast %13 : vector<32x1xf32> to vector<32x1024xf32>
    %16 = vector.broadcast %14 : vector<1x1024xf32> to vector<32x1024xf32>
    %17 = arith.mulf %15, %16 : vector<32x1024xf32>
    %18 = arith.addf %12, %17 : vector<32x1024xf32>
    %c0_3 = arith.constant 0 : index
    %c0_4 = arith.constant 0 : index
    %19 = vector.load %arg3[%c0_3, %c0_4] : memref<32x1xf32, #tpu.memory_space<vmem>>, vector<32x1xf32>
    %20 = vector.broadcast %19 : vector<32x1xf32> to vector<32x1024xf32>
    %21 = arith.addf %18, %20 : vector<32x1024xf32>
    %cst = arith.constant 0.000000e+00 : f32
    %22 = vector.broadcast %cst : f32 to vector<32x1024xf32>
    %23 = arith.maximumf %21, %22 : vector<32x1024xf32>
    %c0_5 = arith.constant 0 : index
    %c0_6 = arith.constant 0 : index
    %24 = vector.load %arg4[%c0_5, %c0_6] : memref<32x32xf32, #tpu.memory_space<vmem>>, vector<32x32xf32>
    %cst_7 = arith.constant dense<0.000000e+00> : vector<32x1024xf32>
    %25 = tpu.matmul %24, %23, %cst_7 {dimension_numbers = #tpu.dot_dimension_numbers<[1], [0], [0], [1], [0, 0, 1, 1], [], []>} : vector<32x32xf32>, vector<32x1024xf32>, vector<32x1024xf32> -> vector<32x1024xf32>
    %c0_8 = arith.constant 0 : index
    %c0_9 = arith.constant 0 : index
    %26 = vector.load %arg5[%c0_8, %c0_9] : memref<32x1xf32, #tpu.memory_space<vmem>>, vector<32x1xf32>
    %27 = vector.broadcast %26 : vector<32x1xf32> to vector<32x1024xf32>
    %28 = arith.addf %25, %27 : vector<32x1024xf32>
    %cst_10 = arith.constant 0.000000e+00 : f32
    %29 = vector.broadcast %cst_10 : f32 to vector<32x1024xf32>
    %30 = arith.maximumf %28, %29 : vector<32x1024xf32>
    %c0_11 = arith.constant 0 : index
    %c0_12 = arith.constant 0 : index
    %31 = vector.load %arg6[%c0_11, %c0_12] : memref<3x32xf32, #tpu.memory_space<vmem>>, vector<3x32xf32>
    %cst_13 = arith.constant dense<0.000000e+00> : vector<3x1024xf32>
    %32 = tpu.matmul %31, %30, %cst_13 {dimension_numbers = #tpu.dot_dimension_numbers<[1], [0], [0], [1], [0, 0, 1, 1], [], []>} : vector<3x32xf32>, vector<32x1024xf32>, vector<3x1024xf32> -> vector<3x1024xf32>
    %c0_14 = arith.constant 0 : index
    %c0_15 = arith.constant 0 : index
    %33 = vector.load %arg7[%c0_14, %c0_15] : memref<3x1xf32, #tpu.memory_space<vmem>>, vector<3x1xf32>
    %34 = vector.broadcast %33 : vector<3x1xf32> to vector<3x1024xf32>
    %35 = arith.addf %32, %34 : vector<3x1024xf32>
    %36 = arith.addf %0, %35 : vector<3x1024xf32>
    %c0_16 = arith.constant 0 : index
    %c0_17 = arith.constant 0 : index
    %37 = vector.load %arg8[%c0_16, %c0_17] : memref<3x1024xf32, #tpu.memory_space<vmem>>, vector<3x1024xf32>
    tpu.vector_store %arg8[%c0_16, %c0_17], %36 {strides = array<i32>} : memref<3x1024xf32, #tpu.memory_space<vmem>>, vector<3x1024xf32>,
    return
  }
  func.func @transform_0(%arg0: i32) -> (i32, i32) {
    %c0_i32 = arith.constant 0 : i32
    %c0_i32_0 = arith.constant 0 : i32
    return %c0_i32, %arg0 : i32, i32
  }
  func.func @transform_1(%arg0: i32) -> (i32, i32) {
    %c0_i32 = arith.constant 0 : i32
    %c0_i32_0 = arith.constant 0 : i32
    %c0_i32_1 = arith.constant 0 : i32
    return %c0_i32, %c0_i32_0 : i32, i32
  }
  func.func @transform_2(%arg0: i32) -> (i32, i32) {
    %c0_i32 = arith.constant 0 : i32
    %c0_i32_0 = arith.constant 0 : i32
    %c0_i32_1 = arith.constant 0 : i32
    return %c0_i32, %c0_i32_0 : i32, i32
  }
  func.func @transform_3(%arg0: i32) -> (i32, i32) {
    %c0_i32 = arith.constant 0 : i32
    %c0_i32_0 = arith.constant 0 : i32
    %c0_i32_1 = arith.constant 0 : i32
    return %c0_i32, %c0_i32_0 : i32, i32
  }
  func.func @transform_4(%arg0: i32) -> (i32, i32) {
    %c0_i32 = arith.constant 0 : i32
    %c0_i32_0 = arith.constant 0 : i32
    %c0_i32_1 = arith.constant 0 : i32
    return %c0_i32, %c0_i32_0 : i32, i32
  }
  func.func @transform_5(%arg0: i32) -> (i32, i32) {
    %c0_i32 = arith.constant 0 : i32
    %c0_i32_0 = arith.constant 0 : i32
    %c0_i32_1 = arith.constant 0 : i32
    return %c0_i32, %c0_i32_0 : i32, i32
  }
  func.func @transform_6(%arg0: i32) -> (i32, i32) {
    %c0_i32 = arith.constant 0 : i32
    %c0_i32_0 = arith.constant 0 : i32
    %c0_i32_1 = arith.constant 0 : i32
    return %c0_i32, %c0_i32_0 : i32, i32
  }
  func.func @transform_7(%arg0: i32) -> (i32, i32) {
    %c0_i32 = arith.constant 0 : i32
    %c0_i32_0 = arith.constant 0 : i32
    return %c0_i32, %arg0 : i32, i32
  }
}

</mosaic_0001>

<bundles_post_ra>
// kernel: tpu_custom_call.1
= control target key start
LH: loop header
LB: loop body
LE: loop exit
PB: predicated region body
PF: predicated region fallthrough
CT: control target
= control target key end

     0   :  { %v1379_v2 = vmov 1   ;;  %v1380_v3 = vmov 0   ;;  %v1381_v5 = vmov 2   ;;  %s1959_s0 = inlined_call_operand.vmem [shape: f32[3,1024], index: 0, kind: input, shape index: {}]   ;;  %s1960_s1 = inlined_call_operand.vmem [shape: f32[32,3], index: 1, kind: input, shape index: {}]   ;;  %s1961_s2 = inlined_call_operand.vmem [shape: f32[32,1], index: 2, kind: input, shape index: {}]   ;;  %s1962_s3 = inlined_call_operand.vmem [shape: f32[32,32], index: 3, kind: input, shape index: {}]   ;;  %s1963_s4 = inlined_call_operand.vmem [shape: f32[32,1], index: 4, kind: input, shape index: {}]   ;;  %s1964_s5 = inlined_call_operand.vmem [shape: f32[3,32], index: 5, kind: input, shape index: {}]   ;;  %s1965_s6 = inlined_call_operand.vmem [shape: f32[3,1], index: 6, kind: input, shape index: {}]   ;;  %s1966_s7 = inlined_call_operand.hbm [shape: f32[3,1024], index: 7, kind: output, shape index: {}]  }
   0x1   :  { %v34_v0 = vld [vmem:[%s1960_s1 + $0x18] sm:$0xff]  ;;  %v33_v1 = vld [vmem:[%s1960_s1 + $0x10] sm:$0xff]  ;;  %1341 = vset.pattern.permute.xlu0 %v1379_v2  ;;  %1342 = vset.pattern.permute.xlu1 %v1380_v3  ;;  %v32_v4 = vld [vmem:[%s1960_s1 + $0x8] sm:$0xff] }
   0x2   :  { %176 = vperm.xlu0 %1341, %v34_v0   ;;  %47 = vperm.xlu1 %1342, %v33_v1  }
   0x6   :  { %1348 = vset.pattern.permute.xlu0 %v1381_v5  ;;  %1343 = vset.pattern.permute.xlu1 %v1379_v2 }
   0x7   :  { %12 = vsyncpa [#allocation3], 0  ;;  %172 = vperm.xlu1 %1343, %v33_v1   ;;  %320 = vperm.xlu0 %1348, %v32_v4   ;;  %v31_v6 = vld [vmem:[%s1960_s1] sm:$0xff]  ;;  %v469_v7 = vld [vmem:[%s1961_s2 + $0x10] sm:$0xff]  ;;  %v1967_v15 = vmov 0.0   ;;  %v59_v17 = vlaneseq  ;;  %vm583_vm0 = vcmask 261120  }
   0x8   :  { %v562_v8 = vld [vmem:[%s1963_s4 + $0x18] sm:$0xff]  ;;  %v560_v9 = vld [vmem:[%s1963_s4 + $0x8] sm:$0xff]  ;;  %v985_v11 = vld [vmem:[%s1965_s6] sm:$0x7]  ;;  %660 = vmatprep.mubr.f32.mxu0 %v1967_v15  ;;  %749 = vmatprep.mubr.f32.mxu1 %v1967_v15  ;;  %s1383_s19 = smov [#allocation2]  }
   0x9   :  { %v470_v10 = vld [vmem:[%s1961_s2 + $0x18] sm:$0xff]  ;;  %v468_v12 = vld [vmem:[%s1961_s2 + $0x8] sm:$0xff]  ;;  %v467_v13 = vld [vmem:[%s1961_s2] sm:$0xff]  ;;  %v60_v18 = vshrl.u32 %v59_v17, 7  ;;  %s1308_s20 = sshll.u32 %s1383_s19, 4  ;;  %s1309_s20 = int_to_ptr.vmem [resolvable:$true] %s1308_s20 }
   0xa   :  { %v561_v14 = vld [vmem:[%s1963_s4 + $0x10] sm:$0xff]  ;;  %v559_v16 = vld [vmem:[%s1963_s4] sm:$0xff]  ;;  %v28_v24 = vld [vmem:[%s1959_s0 + $0x8] sm:$0x77]  ;;  %s1357_s24 = scalar_lea.vmem %s1309_s20, 512  ;;  %p1362_p1 = scmp.lt.s32.totalorder %s1309_s20, %s1309_s20 }
   0xb   :  { %1344 = vset.pattern.permute.xlu1 %v1381_v5  ;;  %1349 = vset.pattern.permute.xlu0 %v1380_v3  ;;  %v61_v19 = vsub.s32 0, %v60_v18  ;;  %v65_v20 = vsub.s32 4, %v60_v18  ;;  %v185_v21 = vsub.s32 5, %v60_v18  ;;  %v27_v22 = vld [vmem:[%s1959_s0] sm:$0x77]  ;;  %v337_v23 = vsub.s32 6, %v60_v18  ;;  %p1358_p0 = scmp.ne.s32.totalorder %s1309_s20, %s1357_s24  ;;  %p1363_p2 = scmp.lt.s32.totalorder %s1357_s24, %s1357_s24 }
   0xc   :  { %328 = vperm.xlu1 %1344, %v34_v0   ;;  %52 = vperm.xlu0 %1349, %v34_v0   ;;  %v181_v25 = vsub.s32 1, %v60_v18  ;;  %v333_v30 = vsub.s32 2, %v60_v18  ;;  %v29_v39 = vld [vmem:[%s1959_s0 + $0x10] sm:$0x77]  ;;  %v30_v40 = vld [vmem:[%s1959_s0 + $0x18] sm:$0x77] }
   0xd   :  { %v66_v26 = vrot.slane %v27_v22, %v65_v20  ;;  %v186_v27 = vrot.slane %v27_v22, %v185_v21  ;;  %v74_v28 = vrot.slane %v28_v24, %v65_v20  ;;  %v62_v29 = vrot.slane %v27_v22, %v61_v19  ;;  %p1364_p3 = por %p1363_p2, %p1362_p1 }
   0xe   :  { %v338_v31 = vrot.slane %v27_v22, %v337_v23  ;;  %v194_v32 = vrot.slane %v28_v24, %v185_v21  ;;  %v346_v33 = vrot.slane %v28_v24, %v337_v23  ;;  %v182_v34 = vrot.slane %v27_v22, %v181_v25 }
   0xf   :  { %v1471_v35 = vrot.slane %v66_v26, %v61_v19  ;;  %v1473_v36 = vrot.slane %v186_v27, %v181_v25  ;;  %v1475_v37 = vrot.slane %v74_v28, %v61_v19  ;;  %v1477_v38 = vrot.slane %v62_v29, %v61_v19  ;;  %p1365_p4 = pnand %p1364_p3, %p1358_p0 }
  0x10   :  { %1345 = vset.pattern.permute.xlu1 %v1379_v2  ;;  %42 = vperm.xlu0 %1349, %v32_v4   ;;  %v1485_v41 = vrot.slane %v338_v31, %v333_v30  ;;  %v1487_v42 = vrot.slane %v194_v32, %v181_v25  ;;  %v1489_v43 = vrot.slane %v346_v33, %v333_v30 }
  0x11   :  { %168 = vperm.xlu1 %1345, %v32_v4   ;;  %v334_v44 = vrot.slane %v27_v22, %v333_v30  ;;  %v1491_v45 = vrot.slane %v182_v34, %v181_v25  ;;  %v70_v46 = vrot.slane %v28_v24, %v61_v19  ;;  %v190_v47 = vrot.slane %v28_v24, %v181_v25 }
  0x12   :  { %v342_v48 = vrot.slane %v28_v24, %v333_v30  ;;  %v82_v49 = vrot.slane %v29_v39, %v65_v20  ;;  %v202_v50 = vrot.slane %v29_v39, %v185_v21  ;;  %v354_v51 = vrot.slane %v29_v39, %v337_v23 }
  0x13   :  { %v90_v52 = vrot.slane %v30_v40, %v65_v20  ;;  %v210_v53 = vrot.slane %v30_v40, %v185_v21  ;;  %v362_v54 = vrot.slane %v30_v40, %v337_v23  ;;  %v78_v55 = vrot.slane %v29_v39, %v61_v19 }
  0x14   :  { %37 = vperm.xlu0 %1349, %v31_v6   ;;  %v198_v56 = vrot.slane %v29_v39, %v181_v25  ;;  %v350_v57 = vrot.slane %v29_v39, %v333_v30  ;;  %v86_v58 = vrot.slane %v30_v40, %v61_v19  ;;  %v206_v59 = vrot.slane %v30_v40, %v181_v25 }
  0x15   :  { %1346 = vset.pattern.permute.xlu1 %v1381_v5  ;;  %v358_v60 = vrot.slane %v30_v40, %v333_v30  ;;  %v1493_v63 = vrot.slane %v334_v44, %v333_v30  ;;  %v1495_v0 = vrot.slane %v70_v46, %v61_v19  ;;  %v1503_v4 = vrot.slane %v202_v50, %v181_v25 }
  0x16   :  { %324 = vperm.xlu1 %1346, %v33_v1   ;;  %v1497_v1 = vrot.slane %v190_v47, %v181_v25 }
  0x17   :  { %1988 = vst [vmem:[#allocation6_spill] sm:$0xff] %v1503_v4 }
  0x18   :  { %483 = vperm.xlu0 %1349, %v469_v7   ;;  %v1509_v7 = vrot.slane %v210_v53, %v181_v25 }
  0x1a   :  { %1347 = vset.pattern.permute.xlu1 %v1379_v2  ;;  %v1499_v2 = vrot.slane %v342_v48, %v333_v30  ;;  %1991 = vst [vmem:[#allocation9_spill] sm:$0xff] %v1509_v7 }
  0x1b   :  { %164 = vperm.xlu1 %1347, %v31_v6  }
  0x1c   :  { %580 = vperm.xlu0 %1349, %v562_v8   ;;  %v1511_v8 = vrot.slane %v362_v54, %v333_v30 }
  0x1f   :  { %1350 = vset.pattern.permute.xlu1 %v1380_v3 }
  0x20   :  { %570 = vperm.xlu0 %1349, %v560_v9   ;;  %488 = vperm.xlu1 %1350, %v470_v10   ;;  %v1513_v9 = vrot.slane %v78_v55, %v61_v19  ;;  %v1515_v10 = vrot.slane %v198_v56, %v181_v25 }
  0x22   :  { %1992 = vst [vmem:[#allocation10_spill] sm:$0xff] %v1515_v10 }
  0x24   :  { %988 = vperm.xlu0 %1349, %v985_v11   ;;  %1351 = vset.pattern.permute.xlu1 %v1381_v5  ;;  %v1505_v5 = vrot.slane %v354_v51, %v333_v30  ;;  %v1517_v11 = vrot.slane %v350_v57, %v333_v30 }
  0x25   :  { %316 = vperm.xlu1 %1351, %v31_v6   ;;  %v1507_v6 = vrot.slane %v90_v52, %v61_v19 }
  0x26   :  { %1989 = vst [vmem:[#allocation7_spill] sm:$0xff] %v1505_v5 }
  0x27   :  { %1990 = vst [vmem:[#allocation8_spill] sm:$0xff] %v1507_v6 }
  0x29   :  { %1352 = vset.pattern.permute.xlu1 %v1380_v3  ;;  %v1501_v3 = vrot.slane %v82_v49, %v61_v19 }
  0x2a   :  { %478 = vperm.xlu1 %1352, %v468_v12   ;;  %v1519_v12 = vrot.slane %v86_v58, %v61_v19 }
  0x2b   :  { %1987 = vst [vmem:[#allocation5_spill] sm:$0xff] %v1501_v3 }
  0x2e   :  { %473 = vperm.xlu1 %1352, %v467_v13   ;;  %v1521_v13 = vrot.slane %v206_v59, %v181_v25 }
  0x30   :  { %1993 = vst [vmem:[#allocation11_spill] sm:$0xff] %v1521_v13 }
  0x32   :  { %575 = vperm.xlu1 %1352, %v561_v14   ;;  %v1523_v14 = vrot.slane %v358_v60, %v333_v30 }
  0x36   :  { %565 = vperm.xlu1 %1352, %v559_v16  }
  0x7d   :  { %v48_v61 = vpop.permute.xlu1 %47  ;;  %v177_v62 = vpop.permute.xlu0 %176 }
  0x7e   :  { %v276_v16 = vmul.f32 %v1473_v36, %v177_v62  ;;  %v278_v17 = vmul.f32 %v1487_v42, %v177_v62  ;;  %v275_v18 = vmul.f32 %v1491_v45, %v177_v62  ;;  %v277_v20 = vmul.f32 %v1497_v1, %v177_v62 }
  0x7f   :  { %v148_v23 = vmul.f32 %v1471_v35, %v48_v61  ;;  %v150_v24 = vmul.f32 %v1475_v37, %v48_v61  ;;  %v147_v19 = vmul.f32 %v1477_v38, %v48_v61  ;;  %v149_v25 = vmul.f32 %v1495_v0, %v48_v61 }
  0x80   :  { %v1538_v30 = vmul.f32 %v1503_v4, %v177_v62  ;;  %v1541_v31 = vmul.f32 %v1509_v7, %v177_v62  ;;  %v1544_v32 = vmul.f32 %v1515_v10, %v177_v62  ;;  %v1547_v33 = vmul.f32 %v1521_v13, %v177_v62 }
  0x81   :  { %v1550_v34 = vmul.f32 %v1501_v3, %v48_v61  ;;  %v1553_v39 = vmul.f32 %v1507_v6, %v48_v61  ;;  %v1556_v40 = vmul.f32 %v1513_v9, %v48_v61  ;;  %v1559_v44 = vmul.f32 %v1519_v12, %v48_v61 }
  0x82   :  { %v173_v21 = vpop.permute.xlu1 %172  ;;  %v321_v22 = vpop.permute.xlu0 %320 }
  0x83   :  { %v268_v26 = vmul.f32 %v1473_v36, %v173_v21  ;;  %v270_v27 = vmul.f32 %v1487_v42, %v173_v21  ;;  %v267_v28 = vmul.f32 %v1491_v45, %v173_v21  ;;  %v269_v29 = vmul.f32 %v1497_v1, %v173_v21  ;;  %1994 = vst [vmem:[#allocation12_spill] sm:$0xff] %v1550_v34 }
  0x84   :  { %1995 = vst [vmem:[#allocation13_spill] sm:$0xff] %v1553_v39  ;;  %1996 = vst [vmem:[#allocation14_spill] sm:$0xff] %v1556_v40  ;;  %v1562_v46 = vmul.f32 %v1485_v41, %v321_v22  ;;  %v1565_v47 = vmul.f32 %v1489_v43, %v321_v22  ;;  %v1568_v48 = vmul.f32 %v1493_v63, %v321_v22 }
  0x85   :  { %1997 = vst [vmem:[#allocation15_spill] sm:$0xff] %v1559_v44  ;;  %v1571_v49 = vmul.f32 %v1499_v2, %v321_v22  ;;  %v300_v52 = vadd.f32 %v268_v26, %v148_v23  ;;  %v302_v53 = vadd.f32 %v270_v27, %v150_v24  ;;  %v299_v54 = vadd.f32 %v267_v28, %v147_v19 }
  0x86   :  { %v301_v55 = vadd.f32 %v269_v29, %v149_v25  ;;  %v1582_v58 = vmul.f32 %v1503_v4, %v173_v21  ;;  %v1585_v59 = vmul.f32 %v1509_v7, %v173_v21  ;;  %v1592_v62 = vmul.f32 %v1515_v10, %v173_v21 }
  0x87   :  { %v1573_v50 = vpop.permute.xlu1 %328  ;;  %v1575_v51 = vpop.permute.xlu0 %52  ;;  %v1595_v23 = vmul.f32 %v1521_v13, %v173_v21  ;;  %v1598_v24 = vmul.f32 %v1505_v5, %v321_v22  ;;  %v1601_v19 = vmul.f32 %v1511_v8, %v321_v22  ;;  %v1604_v25 = vmul.f32 %v1517_v11, %v321_v22 }
  0x88   :  { %v156_v56 = vmul.f32 %v1471_v35, %v1575_v51  ;;  %v158_v57 = vmul.f32 %v1475_v37, %v1575_v51  ;;  %1998 = vst [vmem:[#allocation16_spill] sm:$0xff] %v1582_v58  ;;  %1999 = vst [vmem:[#allocation17_spill] sm:$0xff] %v1585_v59  ;;  %v155_v60 = vmul.f32 %v1477_v38, %v1575_v51 }
  0x89   :  { %v157_v61 = vmul.f32 %v1495_v0, %v1575_v51  ;;  %2000 = vst [vmem:[#allocation18_spill] sm:$0xff] %v1592_v62  ;;  %2001 = vst [vmem:[#allocation19_spill] sm:$0xff] %v1595_v23  ;;  %v1607_v26 = vmul.f32 %v1523_v14, %v321_v22  ;;  %v428_v28 = vmul.f32 %v1485_v41, %v1573_v50 }
  0x8a   :  { %2002 = vst [vmem:[#allocation20_spill] sm:$0xff] %v1598_v24  ;;  %2003 = vst [vmem:[#allocation21_spill] sm:$0xff] %v1601_v19  ;;  %v430_v21 = vmul.f32 %v1489_v43, %v1573_v50  ;;  %v427_v29 = vmul.f32 %v1493_v63, %v1573_v50  ;;  %v429_v15 = vmul.f32 %v1499_v2, %v1573_v50 }
  0x8b   :  { %2004 = vst [vmem:[#allocation22_spill] sm:$0xff] %v1604_v25  ;;  %2005 = vst [vmem:[#allocation23_spill] sm:$0xff] %v1607_v26  ;;  %v1609_v27 = vpop.permute.xlu0 %42  ;;  %v308_v25 = vadd.f32 %v276_v16, %v156_v56  ;;  %v310_v19 = vadd.f32 %v278_v17, %v158_v57  ;;  %v307_v10 = vadd.f32 %v275_v18, %v155_v60 }
  0x8c   :  { %2006 = vst [vmem:[#allocation24_spill] sm:$0xff] %v1609_v27  ;;  %v1619_v13 = vpop.permute.xlu1 %168  ;;  %v140_v22 = vmul.f32 %v1471_v35, %v1609_v27  ;;  %v142_v26 = vmul.f32 %v1475_v37, %v1609_v27  ;;  %v309_v24 = vadd.f32 %v277_v20, %v157_v61  ;;  %v139_v23 = vmul.f32 %v1477_v38, %v1609_v27 }
  0x8d   :  { %2007 = vst [vmem:[#allocation25_spill] sm:$0xff] %v1619_v13  ;;  %v260_v7 = vmul.f32 %v1473_v36, %v1619_v13  ;;  %v262_v4 = vmul.f32 %v1487_v42, %v1619_v13  ;;  %v259_v16 = vmul.f32 %v1491_v45, %v1619_v13  ;;  %v141_v17 = vmul.f32 %v1495_v0, %v1609_v27 }
  0x8e   :  { %v261_v56 = vmul.f32 %v1497_v1, %v1619_v13  ;;  %v160_v20 = vmul.f32 %v1501_v3, %v1575_v51  ;;  %v432_v57 = vmul.f32 %v1505_v5, %v1573_v50  ;;  %v162_v60 = vmul.f32 %v1507_v6, %v1575_v51 }
  0x8f   :  { %v1637_v18 = vpop.permute.xlu0 %37  ;;  %v434_v61 = vmul.f32 %v1511_v8, %v1573_v50  ;;  %v460_v44 = vadd.f32 %v428_v28, %v308_v25  ;;  %v462_v62 = vadd.f32 %v430_v21, %v310_v19  ;;  %v292_v27 = vadd.f32 %v260_v7, %v140_v22 }
  0x90   :  { %v294_v40 = vadd.f32 %v262_v4, %v142_v26  ;;  %v459_v13 = vadd.f32 %v427_v29, %v307_v10  ;;  %v461_v39 = vadd.f32 %v429_v15, %v309_v24  ;;  %v291_v58 = vadd.f32 %v259_v16, %v139_v23 }
  0x91   :  { %v1647_v59 = vpop.permute.xlu1 %324  ;;  %v293_v34 = vadd.f32 %v261_v56, %v141_v17  ;;  %v132_v4 = vmul.f32 %v1471_v35, %v1637_v18  ;;  %v134_v15 = vmul.f32 %v1475_v37, %v1637_v18  ;;  %v312_v7 = vadd.f32 %v1538_v30, %v160_v20 }
  0x92   :  { %v420_v3 = vmul.f32 %v1485_v41, %v1647_v59  ;;  %v422_v5 = vmul.f32 %v1489_v43, %v1647_v59  ;;  %v419_v6 = vmul.f32 %v1493_v63, %v1647_v59  ;;  %v421_v19 = vmul.f32 %v1499_v2, %v1647_v59 }
  0x93   :  { %v314_v10 = vadd.f32 %v1541_v31, %v162_v60  ;;  %v1664_v25 = vadd.f32 %v1562_v46, %v292_v27  ;;  %v1667_v26 = vadd.f32 %v1565_v47, %v294_v40  ;;  %v1669_v28 = vpop.permute.xlu0 %483  ;;  %v131_v35 = vmul.f32 %v1477_v38, %v1637_v18 }
  0x94   :  { %v452_v23 = vadd.f32 %v420_v3, %v300_v52  ;;  %v454_v24 = vadd.f32 %v422_v5, %v302_v53  ;;  %v451_v21 = vadd.f32 %v419_v6, %v299_v54  ;;  %v453_v29 = vadd.f32 %v421_v19, %v301_v55  ;;  %v2009_v19 = vld [vmem:[#allocation12_spill] sm:$0xff] }
  0x95   :  { %v133_v37 = vmul.f32 %v1495_v0, %v1637_v18  ;;  %v1680_v31 = vadd.f32 %v1568_v48, %v291_v58  ;;  %v1683_v40 = vadd.f32 %v1571_v49, %v293_v34  ;;  %v159_v0 = vmul.f32 %v1513_v9, %v1575_v51 }
  0x96   :  { %v1675_v30 = vpop.permute.xlu1 %164  ;;  %v508_v3 = vadd.f32 %v1669_v28, %v452_v23  ;;  %v510_v5 = vadd.f32 %v1669_v28, %v454_v24  ;;  %v161_v46 = vmul.f32 %v1519_v12, %v1575_v51  ;;  %v464_v47 = vadd.f32 %v432_v57, %v312_v7  ;;  %v2011_v7 = vld [vmem:[#allocation13_spill] sm:$0xff] }
  0x97   :  { %v252_v6 = vmul.f32 %v1473_v36, %v1675_v30  ;;  %v254_v38 = vmul.f32 %v1487_v42, %v1675_v30  ;;  %v466_v52 = vadd.f32 %v434_v61, %v314_v10  ;;  %v431_v48 = vmul.f32 %v1517_v11, %v1573_v50  ;;  %v2012_v10 = vld [vmem:[#allocation17_spill] sm:$0xff] }
  0x98   :  { %v433_v34 = vmul.f32 %v1523_v14, %v1573_v50  ;;  %v507_v49 = vadd.f32 %v1669_v28, %v451_v21  ;;  %v509_v36 = vadd.f32 %v1669_v28, %v453_v29  ;;  %v251_v42 = vmul.f32 %v1491_v45, %v1675_v30  ;;  %v2008_v50 = vld [vmem:[#allocation7_spill] sm:$0xff] }
  0x99   :  { %v253_v53 = vmul.f32 %v1497_v1, %v1675_v30  ;;  %v540_v54 = vmax.f32 %v508_v3, 0.0  ;;  %v542_v51 = vmax.f32 %v510_v5, 0.0  ;;  %v284_v55 = vadd.f32 %v252_v6, %v132_v4  ;;  %v2010_v4 = vld [vmem:[#allocation16_spill] sm:$0xff]  ;;  %v2013_v5 = vld [vmem:[#allocation14_spill] sm:$0xff] }
  0x9a   :  { %v286_v58 = vadd.f32 %v254_v38, %v134_v15  ;;  %v311_v22 = vadd.f32 %v1544_v32, %v159_v0  ;;  %v313_v16 = vadd.f32 %v1547_v33, %v161_v46  ;;  %v424_v17 = vmul.f32 %v2008_v50, %v1647_v59 }
  0x9b   :  { %v489_v27 = vpop.permute.xlu1 %488  ;;  %v426_v56 = vmul.f32 %v1511_v8, %v1647_v59  ;;  %v283_v1 = vadd.f32 %v251_v42, %v131_v35  ;;  %v285_v61 = vadd.f32 %v253_v53, %v133_v37  ;;  %v304_v15 = vadd.f32 %v2010_v4, %v2009_v19 }
  0x9c   :  { %v516_v20 = vadd.f32 %v489_v27, %v460_v44  ;;  %v518_v45 = vadd.f32 %v489_v27, %v462_v62  ;;  %v515_v57 = vadd.f32 %v489_v27, %v459_v13  ;;  %v517_v60 = vadd.f32 %v489_v27, %v461_v39  ;;  %v2014_v44 = vld [vmem:[#allocation18_spill] sm:$0xff] }
  0x9d   :  { %v306_v32 = vadd.f32 %v2012_v10, %v2011_v7  ;;  %v1713_v29 = vadd.f32 %v489_v27, %v464_v47  ;;  %v463_v3 = vadd.f32 %v431_v48, %v311_v22  ;;  %v303_v62 = vadd.f32 %v2014_v44, %v2013_v5  ;;  %v2021_v7 = vld [vmem:[#allocation8_spill] sm:$0xff] }
  0x9e   :  { %v548_v23 = vmax.f32 %v516_v20, 0.0  ;;  %v550_v33 = vmax.f32 %v518_v45, 0.0  ;;  %v547_v24 = vmax.f32 %v515_v57, 0.0  ;;  %v549_v21 = vmax.f32 %v517_v60, 0.0  ;;  %v2019_v45 = vld [vmem:[#allocation25_spill] sm:$0xff]  ;;  %v2020_v57 = vld [vmem:[#allocation6_spill] sm:$0xff] }
  0x9f   :  { %v423_v13 = vmul.f32 %v1517_v11, %v1647_v59  ;;  %v539_v35 = vmax.f32 %v507_v49, 0.0  ;;  %v465_v37 = vadd.f32 %v433_v34, %v313_v16  ;;  %v456_v6 = vadd.f32 %v424_v17, %v304_v15 }
  0xa0   :  { %v1719_v39 = vpop.permute.xlu1 %316  ;;  %620 = vmatprep.subr.mxu0 %v548_v23  ;;  %709 = vmatprep.subr.mxu1 %v550_v33  ;;  %v458_v38 = vadd.f32 %v426_v56, %v306_v32  ;;  %v541_v0 = vmax.f32 %v509_v36, 0.0  ;;  %v1727_v42 = vadd.f32 %v489_v27, %v466_v52  ;;  %v1729_v49 = vadd.f32 %v489_v27, %v463_v3  ;;  %v2018_v56 = vld [vmem:[#allocation5_spill] sm:$0xff] }
  0xa1   :  { %621 = vmatpush1.msra.mxu0 %v547_v24  ;;  %710 = vmatpush1.msra.mxu1 %v549_v21  ;;  %v404_v46 = vmul.f32 %v1485_v41, %v1719_v39  ;;  %v406_v47 = vmul.f32 %v1489_v43, %v1719_v39  ;;  %v403_v48 = vmul.f32 %v1493_v63, %v1719_v39 }
  0xa2   :  { %622 = vmatprep.subr.mxu0 %v540_v54  ;;  %711 = vmatprep.subr.mxu1 %v542_v51  ;;  %v1731_v34 = vadd.f32 %v489_v27, %v465_v37  ;;  %v405_v36 = vmul.f32 %v1499_v2, %v1719_v39  ;;  %v1736_v41 = vadd.f32 %v1669_v28, %v456_v6  ;;  %v2015_v51 = vld [vmem:[#allocation15_spill] sm:$0xff]  ;;  %v2017_v2 = vld [vmem:[#allocation24_spill] sm:$0xff] }
  0xa3   :  { %623 = vmatpush1.msra.mxu0 %v539_v35  ;;  %712 = vmatpush1.msra.mxu1 %v541_v0  ;;  %v455_v43 = vadd.f32 %v423_v13, %v303_v62  ;;  %v436_v53 = vadd.f32 %v404_v46, %v284_v55  ;;  %v438_v22 = vadd.f32 %v406_v47, %v286_v58  ;;  %v2016_v27 = vld [vmem:[#allocation19_spill] sm:$0xff]  ;;  %v552_v62 = vmax.f32 %v1713_v29, 0.0  ;;  %v2023_v35 = vld [vmem:[#allocation20_spill] sm:$0xff]  ;;  %v2024_v47 = vld [vmem:[#allocation10_spill] sm:$0xff] }
  0xa4   :  { %v435_v63 = vadd.f32 %v403_v48, %v283_v1  ;;  %v1739_v54 = vadd.f32 %v1669_v28, %v458_v38  ;;  %v305_v16 = vadd.f32 %v2016_v27, %v2015_v51  ;;  %v425_v17 = vmul.f32 %v1523_v14, %v1647_v59  ;;  %v1785_v29 = vld [vmem:[%s1962_s3] sm:$0xff]  ;;  %v2026_v27 = vld [vmem:[#allocation11_spill] sm:$0xff] }
  0xa5   :  { %v1741_v52 = vpop.permute.xlu1 %478  ;;  %v144_v20 = vmul.f32 %v2018_v56, %v2017_v2  ;;  %v264_v55 = vmul.f32 %v2020_v57, %v2019_v45  ;;  %v437_v4 = vadd.f32 %v405_v36, %v285_v61  ;;  %v146_v10 = vmul.f32 %v2021_v7, %v2017_v2 }
  0xa6   :  { %v500_v58 = vadd.f32 %v1741_v52, %v1664_v25  ;;  %v502_v60 = vadd.f32 %v1741_v52, %v1667_v26  ;;  %v499_v1 = vadd.f32 %v1741_v52, %v1680_v31  ;;  %v501_v19 = vadd.f32 %v1741_v52, %v1683_v40  ;;  %v2022_v40 = vld [vmem:[#allocation9_spill] sm:$0xff] }
  0xa7   :  { %v457_v59 = vadd.f32 %v425_v17, %v305_v16  ;;  %v296_v15 = vadd.f32 %v264_v55, %v144_v20  ;;  %v1764_v26 = vadd.f32 %v1669_v28, %v455_v43  ;;  %v266_v61 = vmul.f32 %v2022_v40, %v2019_v45 }
  0xa8   :  { %v532_v32 = vmax.f32 %v500_v58, 0.0  ;;  %v534_v23 = vmax.f32 %v502_v60, 0.0  ;;  %v531_v33 = vmax.f32 %v499_v1, 0.0  ;;  %v533_v24 = vmax.f32 %v501_v19, 0.0 }
  0xa9   :  { %v1761_v25 = vpop.permute.xlu1 %473  ;;  %v1767_v31 = vadd.f32 %v1669_v28, %v457_v59  ;;  %v143_v21 = vmul.f32 %v1513_v9, %v2017_v2  ;;  %v554_v13 = vmax.f32 %v1727_v42, 0.0  ;;  %v448_v37 = vadd.f32 %v2023_v35, %v296_v15  ;;  %v2028_v59 = vld [vmem:[#allocation23_spill] sm:$0xff] }
  0xaa   :  { %624 = vmatprep.subr.mxu0 %v532_v32  ;;  %713 = vmatprep.subr.mxu1 %v534_v23  ;;  %v492_v3 = vadd.f32 %v1761_v25, %v436_v53  ;;  %v494_v5 = vadd.f32 %v1761_v25, %v438_v22  ;;  %v491_v44 = vadd.f32 %v1761_v25, %v435_v63  ;;  %v2025_v53 = vld [vmem:[#allocation21_spill] sm:$0xff]  ;;  %v551_v63 = vmax.f32 %v1729_v49, 0.0 }
  0xab   :  { %625 = vmatpush1.msra.mxu0 %v531_v33  ;;  %714 = vmatpush1.msra.mxu1 %v533_v24  ;;  %v493_v28 = vadd.f32 %v1761_v25, %v437_v4  ;;  %v298_v6 = vadd.f32 %v266_v61, %v146_v10  ;;  %v263_v48 = vmul.f32 %v2024_v47, %v2019_v45  ;;  %v553_v20 = vmax.f32 %v1731_v34, 0.0  ;;  %v556_v10 = vld [vmem:[%s1962_s3 + $0x8] sm:$0xff] }
  0xac   :  { %v524_v38 = vmax.f32 %v492_v3, 0.0  ;;  %v526_v0 = vmax.f32 %v494_v5, 0.0  ;;  %v523_v46 = vmax.f32 %v491_v44, 0.0  ;;  %v504_v43 = vadd.f32 %v1741_v52, %v448_v37  ;;  %v558_v37 = vld [vmem:[%s1962_s3 + $0x18] sm:$0xff] }
  0xad   :  { %v525_v36 = vmax.f32 %v493_v28, 0.0  ;;  %v450_v22 = vadd.f32 %v2025_v53, %v298_v6  ;;  %v145_v42 = vmul.f32 %v1519_v12, %v2017_v2  ;;  %v295_v51 = vadd.f32 %v263_v48, %v143_v21  ;;  %v557_v28 = vld [vmem:[%s1962_s3 + $0x10] sm:$0xff] }
  0xae   :  { %626 = vmatprep.subr.mxu0 %v524_v38  ;;  %715 = vmatprep.subr.mxu1 %v526_v0  ;;  %v265_v16 = vmul.f32 %v2026_v27, %v2019_v45  ;;  %v136_v17 = vmul.f32 %v2018_v56, %v1637_v18  ;;  %v256_v2 = vmul.f32 %v2020_v57, %v1675_v30  ;;  %v544_v49 = vmax.f32 %v1736_v41, 0.0  ;;  %v2027_v56 = vld [vmem:[#allocation22_spill] sm:$0xff] }
  0xaf   :  { %627 = vmatpush1.msra.mxu0 %v523_v46  ;;  %716 = vmatpush1.msra.mxu1 %v525_v36  ;;  %v506_v55 = vadd.f32 %v1741_v52, %v450_v22  ;;  %v408_v58 = vmul.f32 %v2008_v50, %v1719_v39  ;;  %v447_v45 = vadd.f32 %v2027_v56, %v295_v51  ;;  %v546_v57 = vmax.f32 %v1739_v54, 0.0 }
  0xb0   :  { %1316 = vmatmul.mubr.msk.f32.vlgmr.msra.gmra.mxu0 %vm583_vm0, %v1785_v29  ;;  %1320 = vmatmul.mubr.msk.f32.vlgmr.msra.gmra.mxu1 %vm583_vm0, %v1785_v29  ;;  %v297_v60 = vadd.f32 %v265_v16, %v145_v42  ;;  %v138_v34 = vmul.f32 %v2021_v7, %v1637_v18  ;;  %v288_v1 = vadd.f32 %v256_v2, %v136_v17  ;;  %v543_v41 = vmax.f32 %v1764_v26, 0.0  ;;  %v1877_v42 = vpop.permute.xlu0 %580 }
  0xb1   :  { %798 = vmatprep.subr.mxu0 %v552_v62  ;;  %887 = vmatprep.subr.mxu1 %v554_v13  ;;  %v258_v50 = vmul.f32 %v2022_v40, %v1675_v30  ;;  %v410_v19 = vmul.f32 %v1511_v8, %v1719_v39  ;;  %v503_v4 = vadd.f32 %v1741_v52, %v447_v45  ;;  %v545_v54 = vmax.f32 %v1767_v31, 0.0 }
  0xb2   :  { %799 = vmatpush1.msra.mxu0 %v551_v63  ;;  %888 = vmatpush1.msra.mxu1 %v553_v20  ;;  %v449_v15 = vadd.f32 %v2028_v59, %v297_v60  ;;  %v135_v7 = vmul.f32 %v1513_v9, %v1637_v18  ;;  %v440_v8 = vadd.f32 %v408_v58, %v288_v1  ;;  %v2029_v33 = vmov 0.0  }
  0xb3   :  { %800 = vmatprep.subr.mxu0 %v544_v49  ;;  %889 = vmatprep.subr.mxu1 %v546_v57  ;;  %v290_v32 = vadd.f32 %v258_v50, %v138_v34  ;;  %v255_v23 = vmul.f32 %v2024_v47, %v1675_v30  ;;  %v536_v24 = vmax.f32 %v504_v43, 0.0  ;;  %v407_v26 = vmul.f32 %v1517_v11, %v1719_v39 }
  0xb4   :  { %666 = vmatprep.mubr.f32.mxu0 %v2029_v33  ;;  %755 = vmatprep.mubr.f32.mxu1 %v2029_v33  ;;  %v505_v9 = vadd.f32 %v1741_v52, %v449_v15  ;;  %v137_v31 = vmul.f32 %v1519_v12, %v1637_v18  ;;  %v538_v40 = vmax.f32 %v506_v55, 0.0  ;;  %v496_v61 = vadd.f32 %v1761_v25, %v440_v8  ;;  %v1885_v45 = vpop.permute.xlu0 %570 }
  0xb5   :  { %801 = vmatpush1.msra.mxu0 %v543_v41  ;;  %890 = vmatpush1.msra.mxu1 %v545_v54  ;;  %v442_v21 = vadd.f32 %v410_v19, %v290_v32  ;;  %v287_v3 = vadd.f32 %v255_v23, %v135_v7  ;;  %v535_v5 = vmax.f32 %v503_v4, 0.0  ;;  %v257_v52 = vmul.f32 %v2026_v27, %v1675_v30  ;;  %v1879_v27 = vpop.permute.xlu1 %575 }
  0xb6   :  { %1317 = vmatmul.mubr.msk.f32.gmra.mxu0 %vm583_vm0, %v556_v10  ;;  %1321 = vmatmul.mubr.msk.f32.gmra.mxu1 %vm583_vm0, %v556_v10  ;;  %v537_v44 = vmax.f32 %v505_v9, 0.0  ;;  %v409_v11 = vmul.f32 %v1523_v14, %v1719_v39  ;;  %v528_v12 = vmax.f32 %v496_v61, 0.0 }
  0xb7   :  { %802 = vmatprep.subr.mxu0 %v536_v24  ;;  %891 = vmatprep.subr.mxu1 %v538_v40  ;;  %v498_v18 = vadd.f32 %v1761_v25, %v442_v21  ;;  %v439_v62 = vadd.f32 %v407_v26, %v287_v3  ;;  %v289_v13 = vadd.f32 %v257_v52, %v137_v31 }
  0xb8   :  { %803 = vmatpush1.msra.mxu0 %v535_v5  ;;  %892 = vmatpush1.msra.mxu1 %v537_v44 }
  0xb9   :  { %804 = vmatprep.subr.mxu0 %v528_v12  ;;  %v530_v35 = vmax.f32 %v498_v18, 0.0  ;;  %672 = vmatprep.mubr.f32.mxu0 %v2029_v33  ;;  %v495_v30 = vadd.f32 %v1761_v25, %v439_v62  ;;  %v441_v14 = vadd.f32 %v409_v11, %v289_v13  ;;  %v1896_v59 = vpop.permute.xlu1 %565 }
  0xba   :  { %761 = vmatprep.mubr.f32.mxu1 %v2029_v33  ;;  %1318 = vmatmul.mubr.msk.f32.gmra.mxu0 %vm583_vm0, %v557_v28 }
  0xbb   :  { %893 = vmatprep.subr.mxu1 %v530_v35  ;;  %v527_v39 = vmax.f32 %v495_v30, 0.0  ;;  %1322 = vmatmul.mubr.msk.f32.gmra.mxu1 %vm583_vm0, %v557_v28  ;;  %v497_v6 = vadd.f32 %v1761_v25, %v441_v14 }
  0xbc   :  { %678 = vmatprep.mubr.f32.mxu0 %v2029_v33  ;;  %767 = vmatprep.mubr.f32.mxu1 %v2029_v33 }
  0xbd   :  { %805 = vmatpush1.msra.mxu0 %v527_v39  ;;  %v529_v38 = vmax.f32 %v497_v6, 0.0 }
  0xbe   :  { %1319 = vmatmul.mubr.msk.f32.gmra.mxu0 %vm583_vm0, %v558_v37 }
  0xbf   :  { %1323 = vmatmul.mubr.msk.f32.gmra.mxu1 %vm583_vm0, %v558_v37  ;;  %838 = vmatprep.mubr.f32.mxu0 %v2029_v33 }
  0xc0   :  { %894 = vmatpush1.msra.mxu1 %v529_v38  ;;  %927 = vmatprep.mubr.f32.mxu1 %v2029_v33 }
  0xc2   :  { %1324 = vmatmul.mubr.msk.f32.vlgmr.msra.gmra.mxu0 %vm583_vm0, %v1785_v29 }
  0xc3   :  { %1328 = vmatmul.mubr.msk.f32.vlgmr.msra.gmra.mxu1 %vm583_vm0, %v1785_v29  ;;  %844 = vmatprep.mubr.f32.mxu0 %v2029_v33 }
  0xc4   :  { %933 = vmatprep.mubr.f32.mxu1 %v2029_v33 }
  0xc6   :  { %1325 = vmatmul.mubr.msk.f32.gmra.mxu0 %vm583_vm0, %v556_v10 }
  0xc7   :  { %1329 = vmatmul.mubr.msk.f32.gmra.mxu1 %vm583_vm0, %v556_v10  ;;  %850 = vmatprep.mubr.f32.mxu0 %v2029_v33 }
  0xc8   :  { %939 = vmatprep.mubr.f32.mxu1 %v2029_v33 }
  0xca   :  { %1326 = vmatmul.mubr.msk.f32.gmra.mxu0 %vm583_vm0, %v557_v28 }
  0xcb   :  { %1330 = vmatmul.mubr.msk.f32.gmra.mxu1 %vm583_vm0, %v557_v28  ;;  %856 = vmatprep.mubr.f32.mxu0 %v2029_v33 }
  0xcc   :  { %945 = vmatprep.mubr.f32.mxu1 %v2029_v33 }
  0xce   :  { %1327 = vmatmul.mubr.msk.f32.gmra.mxu0 %vm583_vm0, %v558_v37 }
  0xcf   :  { %1331 = vmatmul.mubr.msk.f32.gmra.mxu1 %vm583_vm0, %v558_v37  ;;  %1058 = vmatprep.mubr.f32.mxu0 %v2029_v33  ;;  %v1912_v37 = vld [vmem:[%s1964_s5] sm:$0x7] }
  0xd0   :  { %1129 = vmatprep.mubr.f32.mxu1 %v2029_v33 }
 0x170   :  { %v662_v25 = vpop.f32.mrf.mxu0  ;;  %v751_v0 = vpop.f32.mrf.mxu1 }
 0x171   :  { %v663_v31 = vadd.f32 %v662_v25, %v1896_v59  ;;  %v752_v5 = vadd.f32 %v751_v0, %v1896_v59 }
 0x172   :  { %v664_v46 = vpop.f32.mrf.mxu0  ;;  %v753_v47 = vpop.f32.mrf.mxu1 }
 0x173   :  { %v665_v32 = vadd.f32 %v664_v46, %v1896_v59  ;;  %v754_v40 = vadd.f32 %v753_v47, %v1896_v59  ;;  %v952_v30 = vmax.f32 %v663_v31, 0.0  ;;  %v954_v6 = vmax.f32 %v752_v5, 0.0 }
 0x175   :  { %v953_v28 = vmax.f32 %v665_v32, 0.0  ;;  %v955_v14 = vmax.f32 %v754_v40, 0.0 }
 0x176   :  { %v668_v48 = vpop.f32.mrf.mxu0  ;;  %v757_v36 = vpop.f32.mrf.mxu1 }
 0x177   :  { %v669_v15 = vadd.f32 %v668_v48, %v1885_v45  ;;  %v758_v23 = vadd.f32 %v757_v36, %v1885_v45 }
 0x178   :  { %v670_v29 = vpop.f32.mrf.mxu0  ;;  %v759_v43 = vpop.f32.mrf.mxu1 }
 0x179   :  { %v671_v50 = vadd.f32 %v670_v29, %v1885_v45  ;;  %v760_v7 = vadd.f32 %v759_v43, %v1885_v45  ;;  %v960_v12 = vmax.f32 %v669_v15, 0.0  ;;  %v962_v13 = vmax.f32 %v758_v23, 0.0 }
 0x17a   :  { %v674_v53 = vpop.f32.mrf.mxu0 }
 0x17b   :  { %v763_v22 = vpop.f32.mrf.mxu1  ;;  %v675_v60 = vadd.f32 %v674_v53, %v1879_v27  ;;  %v961_v44 = vmax.f32 %v671_v50, 0.0  ;;  %v963_v18 = vmax.f32 %v760_v7, 0.0 }
 0x17c   :  { %v676_v63 = vpop.f32.mrf.mxu0  ;;  %v764_v19 = vadd.f32 %v763_v22, %v1879_v27 }
 0x17d   :  { %v765_v51 = vpop.f32.mrf.mxu1  ;;  %v677_v2 = vadd.f32 %v676_v63, %v1879_v27  ;;  %v968_v61 = vmax.f32 %v675_v60, 0.0 }
 0x17e   :  { %v680_v16 = vpop.f32.mrf.mxu0  ;;  %v766_v34 = vadd.f32 %v765_v51, %v1879_v27  ;;  %v970_v52 = vmax.f32 %v764_v19, 0.0 }
 0x17f   :  { %v769_v17 = vpop.f32.mrf.mxu1  ;;  %v681_v20 = vadd.f32 %v680_v16, %v1877_v42  ;;  %v969_v24 = vmax.f32 %v677_v2, 0.0 }
 0x180   :  { %v682_v55 = vpop.f32.mrf.mxu0  ;;  %v770_v58 = vadd.f32 %v769_v17, %v1877_v42  ;;  %v971_v21 = vmax.f32 %v766_v34, 0.0 }
 0x181   :  { %v683_v49 = vadd.f32 %v682_v55, %v1877_v42  ;;  %v771_v56 = vpop.f32.mrf.mxu1  ;;  %v976_v54 = vmax.f32 %v681_v20, 0.0 }
 0x182   :  { %v772_v57 = vadd.f32 %v771_v56, %v1877_v42  ;;  %v1890_v1 = vpop.f32.mrf.mxu0  ;;  %v978_v9 = vmax.f32 %v770_v58, 0.0 }
 0x183   :  { %v977_v41 = vmax.f32 %v683_v49, 0.0  ;;  %v1894_v4 = vpop.f32.mrf.mxu1 }
 0x184   :  { %v979_v10 = vmax.f32 %v772_v57, 0.0  ;;  %v1900_v8 = vpop.f32.mrf.mxu0 }
 0x185   :  { %v1904_v26 = vpop.f32.mrf.mxu1  ;;  %1018 = vmatprep.subr.mxu0 %v977_v41  ;;  %v843_v56 = vadd.f32 %v1900_v8, %v1896_v59  ;;  %v930_v41 = vadd.f32 %v1894_v4, %v1896_v59 }
 0x186   :  { %1089 = vmatprep.subr.mxu1 %v979_v10  ;;  %v846_v3 = vpop.f32.mrf.mxu0  ;;  %1019 = vmatpush1.msra.mxu0 %v976_v54 }
 0x187   :  { %v935_v11 = vpop.f32.mrf.mxu1  ;;  %1090 = vmatpush1.msra.mxu1 %v978_v9  ;;  %1020 = vmatprep.subr.mxu0 %v969_v24  ;;  %v847_v55 = vadd.f32 %v846_v3, %v1885_v45  ;;  %v957_v10 = vmax.f32 %v843_v56, 0.0  ;;  %v958_v23 = vmax.f32 %v930_v41, 0.0  ;;  %v989_v24 = vpop.permute.xlu0 %988 }
 0x188   :  { %1091 = vmatprep.subr.mxu1 %v971_v21  ;;  %v848_v62 = vpop.f32.mrf.mxu0  ;;  %1021 = vmatpush1.msra.mxu0 %v968_v61  ;;  %v936_v60 = vadd.f32 %v935_v11, %v1885_v45  ;;  %v1354_v11 = vld [vmem:[%s1959_s0 + $0x8] sm:$0x77] }
 0x189   :  { %v937_v35 = vpop.f32.mrf.mxu1  ;;  %1092 = vmatpush1.msra.mxu1 %v970_v52  ;;  %1022 = vmatprep.subr.mxu0 %v961_v44  ;;  %v849_v17 = vadd.f32 %v848_v62, %v1885_v45  ;;  %v1353_v44 = vld [vmem:[%s1959_s0] sm:$0x77] }
 0x18a   :  { %1093 = vmatprep.subr.mxu1 %v963_v18  ;;  %v852_v39 = vpop.f32.mrf.mxu0  ;;  %1023 = vmatpush1.msra.mxu0 %v960_v12  ;;  %v938_v2 = vadd.f32 %v937_v35, %v1885_v45  ;;  %v964_v45 = vmax.f32 %v847_v55, 0.0 }
 0x18b   :  { %v941_v38 = vpop.f32.mrf.mxu1  ;;  %1094 = vmatpush1.msra.mxu1 %v962_v13  ;;  %1024 = vmatprep.subr.mxu0 %v953_v28  ;;  %v853_v63 = vadd.f32 %v852_v39, %v1879_v27  ;;  %v965_v15 = vmax.f32 %v849_v17, 0.0 }
 0x18c   :  { %1095 = vmatprep.subr.mxu1 %v955_v14  ;;  %v854_v25 = vpop.f32.mrf.mxu0  ;;  %1025 = vmatpush1.msra.mxu0 %v952_v30  ;;  %v967_v54 = vmax.f32 %v938_v2, 0.0 }
 0x18d   :  { %v943_v0 = vpop.f32.mrf.mxu1  ;;  %1096 = vmatpush1.msra.mxu1 %v954_v6  ;;  %1332 = vmatmul.mubr.msk.f32.vlgmr.msra.gmra.mxu0 %vm583_vm0, %v1912_v37  ;;  %v855_v29 = vadd.f32 %v854_v25, %v1879_v27  ;;  %v972_v50 = vmax.f32 %v853_v63, 0.0 }
 0x18e   :  { %1333 = vmatmul.mubr.msk.f32.vlgmr.msra.gmra.mxu1 %vm583_vm0, %v1912_v37  ;;  %v858_v46 = vpop.f32.mrf.mxu0  ;;  %1200 = vmatprep.mubr.f32.mxu0 %v2029_v33  ;;  %v944_v51 = vadd.f32 %v943_v0, %v1879_v27  ;;  %v1356_v0 = vld [vmem:[%s1959_s0 + $0x18] sm:$0x77] }
 0x18f   :  { %v947_v47 = vpop.f32.mrf.mxu1  ;;  %1271 = vmatprep.mubr.f32.mxu1 %v2029_v33  ;;  %v859_v48 = vadd.f32 %v858_v46, %v1877_v42  ;;  %v942_v33 = vadd.f32 %v941_v38, %v1879_v27  ;;  %v973_v34 = vmax.f32 %v855_v29, 0.0  ;;  %v932_v27 = vadd.f32 %v1904_v26, %v1896_v59  ;;  %v1355_v38 = vld [vmem:[%s1959_s0 + $0x10] sm:$0x77] }
 0x190   :  { %v860_v36 = vpop.f32.mrf.mxu0  ;;  %v948_v43 = vadd.f32 %v947_v47, %v1877_v42  ;;  %v975_v19 = vmax.f32 %v944_v51, 0.0 }
 0x191   :  { %v861_v53 = vadd.f32 %v860_v36, %v1877_v42  ;;  %v949_v22 = vpop.f32.mrf.mxu1  ;;  %v980_v58 = vmax.f32 %v859_v48, 0.0  ;;  %v974_v7 = vmax.f32 %v942_v33, 0.0  ;;  %v959_v32 = vmax.f32 %v932_v27, 0.0 }
 0x192   :  { %v950_v16 = vadd.f32 %v949_v22, %v1877_v42  ;;  %v982_v57 = vmax.f32 %v948_v43, 0.0  ;;  %v841_v42 = vadd.f32 %v1890_v1, %v1896_v59  ;;  %v966_v1 = vmax.f32 %v936_v60, 0.0 }
 0x193   :  { %v981_v20 = vmax.f32 %v861_v53, 0.0 }
 0x194   :  { %v983_v49 = vmax.f32 %v950_v16, 0.0  ;;  %v956_v8 = vmax.f32 %v841_v42, 0.0 }
 0x195   :  { %1160 = vmatprep.subr.mxu0 %v981_v20 }
 0x196   :  { %1231 = vmatprep.subr.mxu1 %v983_v49  ;;  %1161 = vmatpush1.msra.mxu0 %v980_v58 }
 0x197   :  { %1232 = vmatpush1.msra.mxu1 %v982_v57  ;;  %1162 = vmatprep.subr.mxu0 %v973_v34 }
 0x198   :  { %1233 = vmatprep.subr.mxu1 %v975_v19  ;;  %1163 = vmatpush1.msra.mxu0 %v972_v50 }
 0x199   :  { %1234 = vmatpush1.msra.mxu1 %v974_v7  ;;  %1164 = vmatprep.subr.mxu0 %v965_v15 }
 0x19a   :  { %1235 = vmatprep.subr.mxu1 %v967_v54  ;;  %1165 = vmatpush1.msra.mxu0 %v964_v45 }
 0x19b   :  { %1236 = vmatpush1.msra.mxu1 %v966_v1  ;;  %1166 = vmatprep.subr.mxu0 %v957_v10 }
 0x19c   :  { %1237 = vmatprep.subr.mxu1 %v959_v32  ;;  %1167 = vmatpush1.msra.mxu0 %v956_v8 }
 0x19d   :  { %1238 = vmatpush1.msra.mxu1 %v958_v23  ;;  %1334 = vmatmul.mubr.msk.f32.vlgmr.msra.gmra.mxu0 %vm583_vm0, %v1912_v37 }
 0x19e   :  { %1335 = vmatmul.mubr.msk.f32.vlgmr.msra.gmra.mxu1 %vm583_vm0, %v1912_v37 }
 0x24d   :  { %v1060_v4 = vpop.f32.mrf.mxu0 }
 0x24e   :  { %v1131_v59 = vpop.f32.mrf.mxu1  ;;  %v1061_v26 = vadd.f32 %v1060_v4, %v989_v24 }
 0x24f   :  { %v1062_v9 = vpop.f32.mrf.mxu0  ;;  %v1132_v61 = vadd.f32 %v1131_v59, %v989_v24 }
 0x250   :  { %v1063_v31 = vadd.f32 %v1062_v9, %v989_v24  ;;  %v1133_v40 = vpop.f32.mrf.mxu1 }
 0x251   :  { %v1134_v21 = vadd.f32 %v1133_v40, %v989_v24 }
 0x252   :  { %v1286_v3 = vcombine.low %v1061_v26, %v1063_v31 }
 0x253   :  { %v1287_v5 = vcombine.low %v1132_v61, %v1134_v21 }
 0x254   :  { %v1294_v52 = vadd.f32 %v1353_v44, %v1286_v3 }
 0x255   :  { %v1295_v12 = vadd.f32 %v1354_v11, %v1287_v5 }
 0x256   :  { %1298 = vst [vmem:[#allocation2] sm:$0x77] %v1294_v52 }
 0x257   :  { %1299 = vst [vmem:[#allocation2 + $0x8] sm:$0x77] %v1295_v12 }
 0x25d   :  { %v1202_v18 = vpop.f32.mrf.mxu0 }
 0x25e   :  { %v1273_v62 = vpop.f32.mrf.mxu1  ;;  %v1203_v13 = vadd.f32 %v1202_v18, %v989_v24 }
 0x25f   :  { %v1204_v28 = vpop.f32.mrf.mxu0  ;;  %v1274_v14 = vadd.f32 %v1273_v62, %v989_v24 }
 0x260   :  { %v1205_v35 = vadd.f32 %v1204_v28, %v989_v24  ;;  %v1275_v30 = vpop.f32.mrf.mxu1 }
 0x261   :  { %v1276_v39 = vadd.f32 %v1275_v30, %v989_v24 }
 0x262   :  { %v1288_v37 = vcombine.low %v1203_v13, %v1205_v35 }
 0x263   :  { %v1289_v6 = vcombine.low %v1274_v14, %v1276_v39 }
 0x264   :  { %v1296_v25 = vadd.f32 %v1355_v38, %v1288_v37 }
 0x265   :  { %v1297_v46 = vadd.f32 %v1356_v0, %v1289_v6 }
 0x266   :  { %1300 = vst [vmem:[#allocation2 + $0x10] sm:$0x77] %v1296_v25 }
 0x267   :  { %1301 = vst [vmem:[#allocation2 + $0x18] sm:$0x77] %v1297_v46 }
 0x268   :  { %1368 = shalt.err (!%p1365_p4)
}
 0x269   :  { %1311 = dma.vmem_to_hbm [thread:$0]  %s1309_s20, 512, %s1966_s7, [#allocation3]  }
 0x26a   :  { %1377 = dma.done.wait [#allocation3], 512  }
 0x26b   :  { %1378 = vsyncadd [#allocation3], 4294966784 }
 0x26c   :  { %1315 = vsyncpa [#allocation3], 1 }

</bundles_post_ra>
